<compile_context>
chip_gen: v5e
topology: v5e:2x2
jax: 0.10.0
libtpu: 0.0.40
codegen_flags: <defaults>
</compile_context>

<pallas_src>
import functools
import math

import jax
import jax.numpy as jnp
from jax.experimental import pallas as pl
from jax.experimental.pallas import tpu as pltpu


# ------------------------------ Pallas kernels ------------------------------ #

def _se_attn_from_mean(mean, w1, w2, c):
    """Tiny squeeze/excite MLP + height(=2) softmax, all on the VPU.

    mean : (C, 1) pooled per-channel mean
    w1   : (C, d), w2 : (2C, d)
    returns (a0, a1), each (C, 1)
    """
    h = jnp.maximum(jnp.sum(w1 * mean, axis=0, keepdims=True), 0.0)   # (1, d)
    z = jnp.sum(w2 * h, axis=1, keepdims=True)                        # (2C, 1)
    z0, z1 = z[:c, :], z[c:, :]                                       # (C, 1) each
    m = jnp.maximum(z0, z1)
    e0 = jnp.exp(z0 - m)
    e1 = jnp.exp(z1 - m)
    inv = 1.0 / (e0 + e1)
    return e0 * inv, e1 * inv


def _fused_kernel(x1_ref, x2_ref, w1_ref, w2_ref, o_ref):
    """Single-pass path: pool + MLP + softmax + weighted sum for one batch elem.

    x1_ref, x2_ref, o_ref : (C, HW)   full spatial slab (batch dim squeezed)
    w1_ref : (C, d), w2_ref : (2C, d)
    """
    c = w1_ref.shape[0]
    hw = x1_ref.shape[1]
    x1 = x1_ref[...]
    x2 = x2_ref[...]
    s = x1 + x2                                                       # (C, HW)
    mean = jnp.sum(s, axis=1, keepdims=True) * (1.0 / hw)             # (C, 1)
    a0, a1 = _se_attn_from_mean(mean, w1_ref[...], w2_ref[...], c)
    o_ref[...] = a0 * x1 + a1 * x2


def _pool_mlp_softmax_kernel(x1_ref, x2_ref, w1_ref, w2_ref, attn_ref, acc_ref):
    """Tiled phase 1: global avg pool of (x1 + x2) + SE-MLP + height softmax.

    x1_ref, x2_ref : (C, TP)   pixel slab of each branch (batch dim squeezed)
    w1_ref         : (C, d)    first 1x1 conv (no bias), stored transposed
    w2_ref         : (2C, d)   second 1x1 conv (no bias), PyTorch layout
    attn_ref       : (C, 2)    per-channel softmax weights for the two branches
    acc_ref        : (C, 1)    VMEM scratch: running per-channel sum
    """
    p = pl.program_id(1)
    n_p = pl.num_programs(1)

    @pl.when(p == 0)
    def _init():
        acc_ref[...] = jnp.zeros_like(acc_ref)

    # Per-channel partial sum over this pixel block (lane reduce -> XLU).
    s = x1_ref[...] + x2_ref[...]                          # (C, TP)
    acc_ref[...] += jnp.sum(s, axis=1, keepdims=True)      # (C, 1)

    @pl.when(p == n_p - 1)
    def _finalize():
        c = w1_ref.shape[0]
        tp = x1_ref.shape[1]
        mean = acc_ref[...] * (1.0 / (tp * n_p))           # (C, 1)
        a0, a1 = _se_attn_from_mean(mean, w1_ref[...], w2_ref[...], c)
        attn_ref[...] = jnp.concatenate([a0, a1], axis=1)  # (C, 2)


def _apply_attn_kernel(attn_ref, x1_ref, x2_ref, o_ref):
    """Tiled phase 2: out = a0 * x1 + a1 * x2, one fused lane-dense sweep.

    attn_ref : (C, 2)   per-channel weights for this batch element
    x1_ref   : (C, TP)
    x2_ref   : (C, TP)
    o_ref    : (C, TP)
    """
    a = attn_ref[...]                                      # (C, 2)
    o_ref[...] = a[:, 0:1] * x1_ref[...] + a[:, 1:2] * x2_ref[...]


# --------------------------------- Wrapper ---------------------------------- #

_VMEM_LIMIT = 32 * 1024 * 1024          # conservative; fits v5e/v6e/v7x
_FUSED_BUDGET = 24 * 1024 * 1024        # double-buffered working-set budget


def _choose_pixel_block(hw, c, max_bytes=2 * 1024 * 1024):
    """Largest multiple-of-128 divisor of H*W whose (C, TP) f32 slab fits the
    per-buffer budget. Falls back to the full extent."""
    for k in range(1, hw + 1):
        if hw % k:
            continue
        tp = hw // k
        if tp % 128 and tp != hw:
            continue
        if tp * c * 4 <= max_bytes:
            return tp
    return hw


@functools.partial(jax.jit, static_argnames=("block_pixels",))
def skfusion(x1, x2, params, *, block_pixels=None):
    """SKFusion forward for height=2. x1, x2: (B, C, H, W) NCHW."""
    # TODO(synk): height is fixed at 2 (the module default); height > 2 would
    # need a stacked-input variant of the kernels.
    assert x1.shape == x2.shape and x1.ndim == 4
    B, C, H, W = x1.shape
    HW = H * W

    # Free metadata reshape: (B, C, H, W) -> (B, C, H*W); spatial goes to lanes.
    x1f = x1.reshape(B, C, HW).astype(jnp.float32)
    x2f = x2.reshape(B, C, HW).astype(jnp.float32)
    w1 = params["w1"].astype(jnp.float32)                  # (C, d)
    w2 = params["w2"].astype(jnp.float32)                  # (2C, d)
    d = w1.shape[1]

    # Working set of the fused path: 2 inputs + 1 output, double-buffered.
    fused_bytes = 6 * C * HW * 4 + (C * d + 2 * C * d) * 4
    use_fused = block_pixels is None and fused_bytes <= _FUSED_BUDGET

    if use_fused:
        # ---- Single pass: pool + MLP + softmax + weighted sum ------------- #
        out = pl.pallas_call(
            _fused_kernel,
            out_shape=jax.ShapeDtypeStruct((B, C, HW), jnp.float32),
            grid_spec=pltpu.PrefetchScalarGridSpec(
                num_scalar_prefetch=0,
                grid=(B,),
                in_specs=[
                    pl.BlockSpec((None, C, HW), lambda b: (b, 0, 0)),
                    pl.BlockSpec((None, C, HW), lambda b: (b, 0, 0)),
                    pl.BlockSpec((C, d), lambda b: (0, 0)),
                    pl.BlockSpec((2 * C, d), lambda b: (0, 0)),
                ],
                out_specs=pl.BlockSpec((None, C, HW), lambda b: (b, 0, 0)),
            ),
            compiler_params=pltpu.CompilerParams(
                dimension_semantics=("parallel",),
                vmem_limit_bytes=_VMEM_LIMIT),
        )(x1f, x2f, w1, w2)
        return out.reshape(B, C, H, W)

    # ---- Tiled fallback: two pipelined passes ------------------------------ #
    tp = block_pixels if block_pixels is not None else _choose_pixel_block(HW, C)
    assert HW % tp == 0 and (tp % 128 == 0 or tp == HW), "bad pixel block"
    P = HW // tp

    # Phase 1: pooled stats + SE-MLP + softmax -> (B, C, 2) weights.
    attn = pl.pallas_call(
        _pool_mlp_softmax_kernel,
        out_shape=jax.ShapeDtypeStruct((B, C, 2), jnp.float32),
        grid_spec=pltpu.PrefetchScalarGridSpec(
            num_scalar_prefetch=0,
            grid=(B, P),
            in_specs=[
                pl.BlockSpec((None, C, tp), lambda b, p: (b, 0, p)),
                pl.BlockSpec((None, C, tp), lambda b, p: (b, 0, p)),
                pl.BlockSpec((C, d), lambda b, p: (0, 0)),        # tiny weights,
                pl.BlockSpec((2 * C, d), lambda b, p: (0, 0)),    # kept resident
            ],
            out_specs=pl.BlockSpec((None, C, 2), lambda b, p: (b, 0, 0)),
            scratch_shapes=[pltpu.VMEM((C, 1), jnp.float32)],
        ),
        compiler_params=pltpu.CompilerParams(
            dimension_semantics=("parallel", "arbitrary"),
            vmem_limit_bytes=_VMEM_LIMIT),
    )(x1f, x2f, w1, w2)

    # Phase 2: fused weighted sum over tiled pixel slabs.
    out = pl.pallas_call(
        _apply_attn_kernel,
        out_shape=jax.ShapeDtypeStruct((B, C, HW), jnp.float32),
        grid_spec=pltpu.PrefetchScalarGridSpec(
            num_scalar_prefetch=0,
            grid=(B, P),
            in_specs=[
                pl.BlockSpec((None, C, 2), lambda b, p: (b, 0, 0)),
                pl.BlockSpec((None, C, tp), lambda b, p: (b, 0, p)),
                pl.BlockSpec((None, C, tp), lambda b, p: (b, 0, p)),
            ],
            out_specs=pl.BlockSpec((None, C, tp), lambda b, p: (b, 0, p)),
        ),
        compiler_params=pltpu.CompilerParams(
            dimension_semantics=("parallel", "parallel"),
            vmem_limit_bytes=_VMEM_LIMIT),
    )(attn, x1f, x2f)

    return out.reshape(B, C, H, W)


# ---------------------------- Parameter creation ----------------------------- #

def make_params(key, dim, height=2, reduction=8):
    d = max(int(dim / reduction), 4)
    k1, k2 = jax.random.split(key)
    # TODO(synk): PyTorch Conv2d uses kaiming-uniform init; plain scaled normal
    # used here (synthetic deterministic weights, distribution is irrelevant).
    w1 = jax.random.normal(k1, (dim, d), jnp.float32) * (1.0 / math.sqrt(dim))
    w2 = jax.random.normal(k2, (dim * height, d), jnp.float32) * (1.0 / math.sqrt(d))
    return {"w1": w1, "w2": w2}


# ------------------------------ JAX reference -------------------------------- #

def reference_forward(x1, x2, p):
    B, C, H, W = x1.shape
    feats_sum = x1 + x2
    y = feats_sum.mean(axis=(2, 3))                         # (B, C)
    h = jnp.maximum(y @ p["w1"], 0.0)                       # (B, d)
    z = h @ p["w2"].T                                       # (B, 2C)
    a = jax.nn.softmax(z.reshape(B, 2, C), axis=1)          # (B, 2, C)
    return a[:, 0, :, None, None] * x1 + a[:, 1, :, None, None] * x2


# ----------------------------------- Main ------------------------------------ #

if __name__ == "__main__":
    key = jax.random.PRNGKey(0)
    k1, k2, kp = jax.random.split(key, 3)

    B, C, H, W = 2, 32, 16, 16          # batch=2, dim=32, spatial=16x16
    x1 = jax.random.normal(k1, (B, C, H, W), jnp.float32)
    x2 = jax.random.normal(k2, (B, C, H, W), jnp.float32)
    params = make_params(kp, dim=C, height=2, reduction=8)

    ref = jax.block_until_ready(reference_forward(x1, x2, params))

    # Fused single-pass path (small spatial extent -> whole slab fits VMEM).
    out_fused = jax.block_until_ready(skfusion(x1, x2, params))
    assert out_fused.shape == (B, C, H, W)
    assert jnp.allclose(out_fused, ref, rtol=1e-3, atol=1e-3), "fused mismatch"

    # Tiled fallback path: block_pixels=128 -> 2 pixel blocks per batch element,
    # exercising the cross-block accumulation (pl.when init/finalize) phase.
    out_tiled = jax.block_until_ready(skfusion(x1, x2, params, block_pixels=128))
    assert out_tiled.shape == (B, C, H, W)
    assert jnp.allclose(out_tiled, ref, rtol=1e-3, atol=1e-3), "tiled mismatch"

    print("KERNEL_OK")
</pallas_src>

<mosaic_0001>
module attributes {stable_mosaic.version = 11 : i64} {
  func.func @_fused_kernel(%arg0: i32, %arg1: memref<1x32x256xf32, #tpu.memory_space<vmem>>, %arg2: memref<1x32x256xf32, #tpu.memory_space<vmem>>, %arg3: memref<32x4xf32, #tpu.memory_space<vmem>>, %arg4: memref<64x4xf32, #tpu.memory_space<vmem>>, %arg5: memref<1x32x256xf32, #tpu.memory_space<vmem>>) attributes {dimension_semantics = [#tpu.dimension_semantics<parallel>], iteration_bounds = array<i64: 2>, scalar_prefetch = 0 : i64, scratch_operands = 0 : i64, tpu.core_type = #tpu.core_type<tc>, window_params = [{transform_indices = @transform_0, window_bounds = array<i64: 1, 32, 256>}, {transform_indices = @transform_1, window_bounds = array<i64: 1, 32, 256>}, {pipeline_mode = #tpu.pipeline_mode<synchronous>, transform_indices = @transform_2, window_bounds = array<i64: 32, 4>}, {pipeline_mode = #tpu.pipeline_mode<synchronous>, transform_indices = @transform_3, window_bounds = array<i64: 64, 4>}, {transform_indices = @transform_4, window_bounds = array<i64: 1, 32, 256>}]} {
    %c0 = arith.constant 0 : index
    %c0_0 = arith.constant 0 : index
    %c0_1 = arith.constant 0 : index
    %0 = vector.load %arg1[%c0, %c0_0, %c0_1] : memref<1x32x256xf32, #tpu.memory_space<vmem>>, vector<1x32x256xf32>
    %1 = vector.shape_cast %0 : vector<1x32x256xf32> to vector<32x256xf32>
    %c0_2 = arith.constant 0 : index
    %c0_3 = arith.constant 0 : index
    %c0_4 = arith.constant 0 : index
    %2 = vector.load %arg2[%c0_2, %c0_3, %c0_4] : memref<1x32x256xf32, #tpu.memory_space<vmem>>, vector<1x32x256xf32>
    %3 = vector.shape_cast %2 : vector<1x32x256xf32> to vector<32x256xf32>
    %4 = arith.addf %1, %3 : vector<32x256xf32>
    %cst = arith.constant dense<0.000000e+00> : vector<32xf32>
    %5 = vector.multi_reduction <add>, %4, %cst [1] : vector<32x256xf32> to vector<32xf32>
    %6 = vector.shape_cast %5 : vector<32xf32> to vector<32x1xf32>
    %cst_5 = arith.constant 3.906250e-03 : f32
    %7 = vector.broadcast %cst_5 : f32 to vector<32x1xf32>
    %8 = arith.mulf %6, %7 : vector<32x1xf32>
    %c0_6 = arith.constant 0 : index
    %c0_7 = arith.constant 0 : index
    %9 = vector.load %arg3[%c0_6, %c0_7] : memref<32x4xf32, #tpu.memory_space<vmem>>, vector<32x4xf32>
    %c0_8 = arith.constant 0 : index
    %c0_9 = arith.constant 0 : index
    %10 = vector.load %arg4[%c0_8, %c0_9] : memref<64x4xf32, #tpu.memory_space<vmem>>, vector<64x4xf32>
    %11 = vector.broadcast %8 : vector<32x1xf32> to vector<32x4xf32>
    %12 = arith.mulf %9, %11 : vector<32x4xf32>
    %cst_10 = arith.constant dense<0.000000e+00> : vector<4xf32>
    %13 = vector.multi_reduction <add>, %12, %cst_10 [0] : vector<32x4xf32> to vector<4xf32>
    %14 = vector.shape_cast %13 : vector<4xf32> to vector<1x4xf32>
    %cst_11 = arith.constant 0.000000e+00 : f32
    %15 = vector.broadcast %cst_11 : f32 to vector<1x4xf32>
    %16 = arith.maximumf %14, %15 : vector<1x4xf32>
    %17 = vector.broadcast %16 : vector<1x4xf32> to vector<64x4xf32>
    %18 = arith.mulf %10, %17 : vector<64x4xf32>
    %cst_12 = arith.constant dense<0.000000e+00> : vector<64xf32>
    %19 = vector.multi_reduction <add>, %18, %cst_12 [1] : vector<64x4xf32> to vector<64xf32>
    %20 = vector.shape_cast %19 : vector<64xf32> to vector<64x1xf32>
    %21 = vector.extract_strided_slice %20 {offsets = [0, 0], sizes = [32, 1], strides = [1, 1]} : vector<64x1xf32> to vector<32x1xf32>
    %22 = vector.extract_strided_slice %20 {offsets = [32, 0], sizes = [32, 1], strides = [1, 1]} : vector<64x1xf32> to vector<32x1xf32>
    %23 = arith.maximumf %21, %22 : vector<32x1xf32>
    %24 = arith.subf %21, %23 : vector<32x1xf32>
    %25 = math.exp %24 : vector<32x1xf32>
    %26 = arith.subf %22, %23 : vector<32x1xf32>
    %27 = math.exp %26 : vector<32x1xf32>
    %28 = arith.addf %25, %27 : vector<32x1xf32>
    %cst_13 = arith.constant 1.000000e+00 : f32
    %29 = vector.broadcast %cst_13 : f32 to vector<32x1xf32>
    %30 = arith.divf %29, %28 : vector<32x1xf32>
    %31 = arith.mulf %25, %30 : vector<32x1xf32>
    %32 = arith.mulf %27, %30 : vector<32x1xf32>
    %33 = vector.broadcast %31 : vector<32x1xf32> to vector<32x256xf32>
    %34 = arith.mulf %33, %1 : vector<32x256xf32>
    %35 = vector.broadcast %32 : vector<32x1xf32> to vector<32x256xf32>
    %36 = arith.mulf %35, %3 : vector<32x256xf32>
    %37 = arith.addf %34, %36 : vector<32x256xf32>
    %c0_14 = arith.constant 0 : index
    %c0_15 = arith.constant 0 : index
    %c0_16 = arith.constant 0 : index
    %38 = vector.load %arg5[%c0_14, %c0_15, %c0_16] : memref<1x32x256xf32, #tpu.memory_space<vmem>>, vector<1x32x256xf32>
    %39 = vector.shape_cast %38 : vector<1x32x256xf32> to vector<32x256xf32>
    %40 = vector.shape_cast %37 : vector<32x256xf32> to vector<1x32x256xf32>
    tpu.vector_store %arg5[%c0_14, %c0_15, %c0_16], %40 {strides = array<i32>} : memref<1x32x256xf32, #tpu.memory_space<vmem>>, vector<1x32x256xf32>,
    return
  }
  func.func @transform_0(%arg0: i32) -> (i32, i32, i32) {
    %c0_i32 = arith.constant 0 : i32
    %c0_i32_0 = arith.constant 0 : i32
    %c0_i32_1 = arith.constant 0 : i32
    return %arg0, %c0_i32, %c0_i32_0 : i32, i32, i32
  }
  func.func @transform_1(%arg0: i32) -> (i32, i32, i32) {
    %c0_i32 = arith.constant 0 : i32
    %c0_i32_0 = arith.constant 0 : i32
    %c0_i32_1 = arith.constant 0 : i32
    return %arg0, %c0_i32, %c0_i32_0 : i32, i32, i32
  }
  func.func @transform_2(%arg0: i32) -> (i32, i32) {
    %c0_i32 = arith.constant 0 : i32
    %c0_i32_0 = arith.constant 0 : i32
    %c0_i32_1 = arith.constant 0 : i32
    return %c0_i32, %c0_i32_0 : i32, i32
  }
  func.func @transform_3(%arg0: i32) -> (i32, i32) {
    %c0_i32 = arith.constant 0 : i32
    %c0_i32_0 = arith.constant 0 : i32
    %c0_i32_1 = arith.constant 0 : i32
    return %c0_i32, %c0_i32_0 : i32, i32
  }
  func.func @transform_4(%arg0: i32) -> (i32, i32, i32) {
    %c0_i32 = arith.constant 0 : i32
    %c0_i32_0 = arith.constant 0 : i32
    %c0_i32_1 = arith.constant 0 : i32
    return %arg0, %c0_i32, %c0_i32_0 : i32, i32, i32
  }
}

</mosaic_0001>

<bundles_post_ra>
// kernel: skfusion.1
= control target key start
LH: loop header
LB: loop body
LE: loop exit
PB: predicated region body
PF: predicated region fallthrough
CT: control target
= control target key end

     0   :  { %s601_s15 = smov 0   ;;  %s779_s0 = inlined_call_operand.vmem [shape: f32[2,32,256], index: 0, kind: input, shape index: {}]   ;;  %s780_s1 = inlined_call_operand.vmem [shape: f32[2,32,256], index: 1, kind: input, shape index: {}]   ;;  %s781_s2 = inlined_call_operand.vmem [shape: f32[32,4], index: 2, kind: input, shape index: {}]   ;;  %s782_s3 = inlined_call_operand.vmem [shape: f32[64,4], index: 3, kind: input, shape index: {}]   ;;  %s783_s4 = inlined_call_operand.vmem [shape: f32[2,32,256], index: 4, kind: output, shape index: {}]  }
   0x1 LB: > { %s520_s16 = sadd.s32 4294967295, %s574_s15   ;;  %p524_p0 = scmp.ge.s32.totalorder %s574_s15, 1  ;;  %s574_s15 = sphi %s601_s15, %s14_s15  }
   0x2   : > { %p172_p1 = scmp.lt.s32.totalorder %s574_s15, 3 }
   0x4   : > { %p173_p2 = pnand %p524_p0, %p172_p1 }
   0x5   : > { %p203_p3 = scmp.lt.s32.totalorder (!%p173_p2), %s520_s16, 1 }
   0x6   : > { %176 = sbr.rel (%p173_p2) target bundleno = 355 (0x163), region = 36 }
   0xb   : > { %s785_s16 = smov (!%p203_p3, %s520_s16), 1  ;;  %v258_v31 = vld [vmem:[%s781_s2] sm:$0xff]  ;;  %v260_v33 = vld [vmem:[%s781_s2 + $0x10] sm:$0xff]  ;;  %v259_v34 = vld [vmem:[%s781_s2 + $0x8] sm:$0xff]  ;;  %vm274_vm0 = vcmask 31744  }
   0xc   : > { %s609_s17 = sshll.u32 %s785_s16, 6  ;;  %v261_v38 = vld [vmem:[%s781_s2 + $0x18] sm:$0xff]  ;;  %v264_v58 = vld [vmem:[%s782_s3 + $0x10] sm:$0xff]  ;;  %v262_v59 = vld [vmem:[%s782_s3] sm:$0xff] }
   0xd   : > { %s207_s20 = scalar_lea.vmem %s779_s0, %s609_s17  ;;  %s212_s23 = scalar_lea.vmem %s780_s1, %s609_s17  ;;  %v265_v57 = vld [vmem:[%s782_s3 + $0x18] sm:$0xff] }
   0xe   : > { %v619_v0 = vld [vmem:[%s207_s20] sm:$0xff]  ;;  %v621_v1 = vld [vmem:[%s207_s20 + $0x8] sm:$0xff]  ;;  %v639_v10 = vld [vmem:[%s207_s20 + $0x10] sm:$0xff]  ;;  %s745_s26 = scalar_lea.vmem %s783_s4, %s609_s17 }
   0xf   : > { %v623_v2 = vld [vmem:[%s212_s23] sm:$0xff]  ;;  %v625_v3 = vld [vmem:[%s212_s23 + $0x8] sm:$0xff]  ;;  %v645_v13 = vld [vmem:[%s207_s20 + $0x18] sm:$0xff] }
  0x10   : > { %v234_v4 = vadd.f32 %v623_v2, %v619_v0  ;;  %v629_v5 = vld [vmem:[%s207_s20 + $0x20] sm:$0xff]  ;;  %v631_v6 = vld [vmem:[%s207_s20 + $0x28] sm:$0xff]  ;;  %v235_v7 = vadd.f32 %v625_v3, %v621_v1  ;;  %v647_v14 = vld [vmem:[%s212_s23 + $0x10] sm:$0xff] }
  0x11   : > { %v635_v8 = vld [vmem:[%s212_s23 + $0x20] sm:$0xff]  ;;  %v637_v9 = vld [vmem:[%s212_s23 + $0x28] sm:$0xff]  ;;  %v649_v15 = vld [vmem:[%s212_s23 + $0x18] sm:$0xff]  ;;  %v236_v22 = vadd.f32 %v647_v14, %v639_v10 }
  0x12   : > { %v238_v11 = vadd.f32 %v635_v8, %v629_v5  ;;  %v239_v12 = vadd.f32 %v637_v9, %v631_v6  ;;  %v242_v16 = vadd.f32 %v235_v7, %v234_v4  ;;  %v651_v17 = vld [vmem:[%s207_s20 + $0x30] sm:$0xff]  ;;  %v653_v18 = vld [vmem:[%s207_s20 + $0x38] sm:$0xff]  ;;  %v237_v23 = vadd.f32 %v649_v15, %v645_v13 }
  0x13   : > { %v655_v19 = vld [vmem:[%s212_s23 + $0x30] sm:$0xff]  ;;  %v657_v21 = vld [vmem:[%s212_s23 + $0x38] sm:$0xff] }
  0x14   : > { %v248_v20 = vadd.f32 %v239_v12, %v238_v11  ;;  %243 = vadd.xlane.f32.xlu0 %v242_v16  ;;  %v240_v24 = vadd.f32 %v655_v19, %v651_v17  ;;  %v241_v25 = vadd.f32 %v657_v21, %v653_v18  ;;  %v245_v26 = vadd.f32 %v237_v23, %v236_v22  ;;  %v268_v12 = vld [vmem:[%s782_s3 + $0x30] sm:$0xff]  ;;  %v267_v16 = vld [vmem:[%s782_s3 + $0x28] sm:$0xff] }
  0x16   : > { %249 = vadd.xlane.f32.xlu1 %v248_v20  ;;  %v251_v27 = vadd.f32 %v241_v25, %v240_v24  ;;  %v263_v20 = vld [vmem:[%s782_s3 + $0x8] sm:$0xff] }
  0x1c   : > { %246 = vadd.xlane.f32.xlu0 %v245_v26 }
  0x1e   : > { %252 = vadd.xlane.f32.xlu1 %v251_v27 }
  0x87   : > { %v244_v28 = vpop.xlane.xlu0 %243 }
  0x88   : > { %v254_v30 = vmul.f32 0.00390625, %v244_v28  ;;  %v266_v28 = vld [vmem:[%s782_s3 + $0x20] sm:$0xff] }
  0x89   : > { %v250_v29 = vpop.xlane.xlu1 %249 }
  0x8a   : > { %v256_v32 = vmul.f32 0.00390625, %v250_v29  ;;  %v270_v36 = vmul.f32 %v258_v31, %v254_v30  ;;  %v269_v31 = vld [vmem:[%s782_s3 + $0x38] sm:$0xff] }
  0x8c   : > { %v272_v41 = vmul.f32 %v260_v33, %v256_v32  ;;  %v275_v44 = vsel %vm274_vm0, %v270_v36, 0.0 }
  0x8e   : > { %v278_v47 = vsel %vm274_vm0, %v272_v41, 0.0 }
  0x8f   : > { %v247_v35 = vpop.xlane.xlu0 %246 }
  0x90   : > { %v255_v37 = vmul.f32 0.00390625, %v247_v35 }
  0x91   : > { %v253_v39 = vpop.xlane.xlu1 %252 }
  0x92   : > { %v257_v40 = vmul.f32 0.00390625, %v253_v39  ;;  %v271_v42 = vmul.f32 %v259_v34, %v255_v37 }
  0x94   : > { %v273_v43 = vmul.f32 %v261_v38, %v257_v40  ;;  %v276_v45 = vsel %vm274_vm0, %v271_v42, 0.0 }
  0x95   : > { %v277_v46 = vadd.f32 %v276_v45, %v275_v44 }
  0x96   : > { %v280_v48 = vsel %vm274_vm0, %v273_v43, 0.0 }
  0x97   : > { %v279_v49 = vadd.f32 %v278_v47, %v277_v46 }
  0x99   : > { %v281_v50 = vadd.f32 %v280_v48, %v279_v49 }
  0x9b   : > { %v282_v51 = vrot.slane %v281_v50, 4 }
  0x9d   : > { %v283_v52 = vadd.f32 %v282_v51, %v281_v50 }
  0x9f   : > { %v284_v53 = vrot.slane %v283_v52, 2 }
  0xa1   : > { %v285_v54 = vadd.f32 %v284_v53, %v283_v52 }
  0xa3   : > { %v286_v55 = vrot.slane %v285_v54, 1 }
  0xa5   : > { %v287_v56 = vadd.f32 %v286_v55, %v285_v54 }
  0xa7   : > { %v288_v60 = vmax.f32 %v287_v56, 0.0 }
  0xa9   : > { %v292_v61 = vmul.f32 %v288_v60, %v265_v57  ;;  %v291_v62 = vmul.f32 %v288_v60, %v264_v58  ;;  %v289_v63 = vmul.f32 %v288_v60, %v262_v59  ;;  %v295_v22 = vmul.f32 %v288_v60, %v268_v12 }
  0xaa   : > { %v294_v23 = vmul.f32 %v288_v60, %v267_v16  ;;  %v290_v24 = vmul.f32 %v288_v60, %v263_v20  ;;  %v293_v29 = vmul.f32 %v288_v60, %v266_v28  ;;  %v296_v32 = vmul.f32 %v288_v60, %v269_v31 }
  0xab   : > { %v306_v4 = vsel %vm274_vm0, %v292_v61, 0.0  ;;  %v303_v7 = vsel %vm274_vm0, %v291_v62, 0.0  ;;  %v297_v11 = vsel %vm274_vm0, %v289_v63, 0.0  ;;  %v315_v25 = vsel %vm274_vm0, %v295_v22, 0.0 }
  0xac   : > { %307 = vadd.xlane.f32.xlu1 %v306_v4  ;;  %304 = vadd.xlane.f32.xlu0 %v303_v7  ;;  %v312_v26 = vsel %vm274_vm0, %v294_v23, 0.0  ;;  %v300_v27 = vsel %vm274_vm0, %v290_v24, 0.0  ;;  %v309_v30 = vsel %vm274_vm0, %v293_v29, 0.0  ;;  %v318_v33 = vsel %vm274_vm0, %v296_v32, 0.0 }
  0xad   : > { %298 = vadd.xlane.f32.xlu2 %v297_v11 }
  0xb4   : > { %316 = vadd.xlane.f32.xlu1 %v315_v25  ;;  %313 = vadd.xlane.f32.xlu0 %v312_v26 }
  0xb5   : > { %301 = vadd.xlane.f32.xlu2 %v300_v27 }
  0xbd   : > { %310 = vadd.xlane.f32.xlu2 %v309_v30 }
  0xc5   : > { %319 = vadd.xlane.f32.xlu2 %v318_v33 }
 0x11f   : > { %v308_v34 = vpop.xlane.xlu1 %307  ;;  %v305_v35 = vpop.xlane.xlu0 %304 }
 0x120   : > { %v299_v36 = vpop.xlane.xlu2 %298 }
 0x127   : > { %v317_v37 = vpop.xlane.xlu1 %316  ;;  %v314_v38 = vpop.xlane.xlu0 %313 }
 0x128   : > { %v323_v39 = vmax.f32 %v305_v35, %v317_v37  ;;  %v302_v40 = vpop.xlane.xlu2 %301 }
 0x129   : > { %v322_v41 = vmax.f32 %v302_v40, %v314_v38 }
 0x12a   : > { %v327_v42 = vsub.f32 %v305_v35, %v323_v39  ;;  %v339_v43 = vsub.f32 %v317_v37, %v323_v39 }
 0x12b   : > { %v326_v44 = vsub.f32 %v302_v40, %v322_v41  ;;  %v338_v45 = vsub.f32 %v314_v38, %v322_v41 }
 0x12c   : > { %v333_v46 = vmul.f32 1.442695, %v327_v42  ;;  %v345_v47 = vmul.f32 1.442695, %v339_v43 }
 0x12d   : > { %v331_v48 = vmul.f32 1.442695, %v326_v44  ;;  %v343_v49 = vmul.f32 1.442695, %v338_v45 }
 0x12e   : > { %544 = vpow2.f32 %v333_v46 }
 0x12f   : > { %546 = vpow2.f32 %v345_v47 }
 0x130   : > { %548 = vpow2.f32 %v331_v48  ;;  %v311_v50 = vpop.xlane.xlu2 %310 }
 0x131   : > { %550 = vpow2.f32 %v343_v49  ;;  %v321_v51 = vmax.f32 %v299_v36, %v311_v50 }
 0x133   : > { %v325_v52 = vsub.f32 %v299_v36, %v321_v51  ;;  %v337_v53 = vsub.f32 %v311_v50, %v321_v51 }
 0x134   : > { %v545_v54 = vpop.eup %544 }
 0x135   : > { %v547_v55 = vpop.eup %546  ;;  %v329_v56 = vmul.f32 1.442695, %v325_v52  ;;  %v341_v57 = vmul.f32 1.442695, %v337_v53 }
 0x136   : > { %v715_v58 = vpop.eup %548  ;;  %v351_v59 = vadd.f32 %v547_v55, %v545_v54 }
 0x137   : > { %v717_v60 = vpop.eup %550  ;;  %552 = vpow2.f32 %v329_v56 }
 0x138   : > { %554 = vrcp.f32 %v351_v59  ;;  %v320_v61 = vpop.xlane.xlu2 %319  ;;  %v350_v62 = vadd.f32 %v717_v60, %v715_v58  ;;  %v394_v27 = vand.u32 2147483648, %v351_v59  ;;  %v392_v30 = vand.u32 2147483647, %v351_v59 }
 0x139   : > { %556 = vpow2.f32 %v341_v57  ;;  %v324_v63 = vmax.f32 %v308_v34, %v320_v61  ;;  %vm388_vm2 = vweird.f32 %v351_v59 }
 0x13a   : > { %558 = vrcp.f32 %v350_v62  ;;  %v395_v33 = vor.u32 1.1754944e-38, %v394_v27  ;;  %v377_v36 = vand.u32 2147483647, %v350_v62  ;;  %v379_v37 = vand.u32 2147483648, %v350_v62 }
 0x13b   : > { %v328_v4 = vsub.f32 %v308_v34, %v324_v63  ;;  %v340_v7 = vsub.f32 %v320_v61, %v324_v63  ;;  %vm393_vm5 = vcmp.eq.f32.partialorder %v392_v30, 8.507059e+37  ;;  %vm373_vm6 = vweird.f32 %v350_v62 }
 0x13c   : > { %vm378_vm8 = vcmp.eq.f32.partialorder %v377_v36, 8.507059e+37  ;;  %v380_v48 = vor.u32 1.1754944e-38, %v379_v37 }
 0x13d   : > { %v721_v11 = vpop.eup %552  ;;  %v335_v16 = vmul.f32 1.442695, %v328_v4  ;;  %v347_v20 = vmul.f32 1.442695, %v340_v7 }
 0x13e   : > { %v555_v12 = vpop.eup %554 }
 0x13f   : > { %v723_v22 = vpop.eup %556  ;;  %v384_v23 = vmul.f32 %v555_v12, %v351_v59  ;;  %560 = vpow2.f32 %v335_v16  ;;  %vm389_vm1 = vweird.f32 %v555_v12 }
 0x140   : > { %v727_v24 = vadd.f32 %v723_v22, %v721_v11  ;;  %v559_v25 = vpop.eup %558  ;;  %562 = vpow2.f32 %v347_v20  ;;  %vm390_vm3 = vmor %vm388_vm2, %vm389_vm1 }
 0x141   : > { %v385_v26 = vsub.f32 1.0, %v384_v23  ;;  %v369_v28 = vmul.f32 %v559_v25, %v350_v62  ;;  %vm374_vm4 = vweird.f32 %v559_v25 }
 0x142   : > { %564 = vrcp.f32 %v727_v24  ;;  %vm375_vm7 = vmor %vm373_vm6, %vm374_vm4  ;;  %vm358_vm10 = vweird.f32 %v727_v24 }
 0x143   : > { %v386_v29 = vmul.f32 %v555_v12, %v385_v26  ;;  %v370_v31 = vsub.f32 1.0, %v369_v28 }
 0x145   : > { %v387_v32 = vadd.f32 %v555_v12, %v386_v29  ;;  %v730_v34 = vpop.eup %560  ;;  %v371_v35 = vmul.f32 %v559_v25, %v370_v31 }
 0x146   : > { %v732_v38 = vpop.eup %562 }
 0x147   : > { %v391_v39 = vsel %vm390_vm3, %v555_v12, %v387_v32  ;;  %v372_v42 = vadd.f32 %v559_v25, %v371_v35  ;;  %v352_v43 = vadd.f32 %v732_v38, %v730_v34 }
 0x148   : > { %v565_v40 = vpop.eup %564  ;;  %v396_v41 = vsel %vm393_vm5, %v395_v33, %v391_v39 }
 0x149   : > { %v415_v44 = vmul.f32 %v545_v54, %v396_v41  ;;  %v419_v45 = vmul.f32 %v547_v55, %v396_v41  ;;  %v354_v46 = vmul.f32 %v565_v40, %v727_v24  ;;  %v376_v47 = vsel %vm375_vm7, %v559_v25, %v372_v42 }
 0x14a   : > { %566 = vrcp.f32 %v352_v43  ;;  %v381_v53 = vsel %vm378_vm8, %v380_v48, %v376_v47  ;;  %v364_v55 = vand.u32 2147483648, %v727_v24  ;;  %vm359_vm9 = vweird.f32 %v565_v40 }
 0x14b   : > { %v425_v49 = vmul.f32 %v415_v44, %v629_v5  ;;  %v426_v50 = vmul.f32 %v415_v44, %v631_v6  ;;  %v433_v51 = vmul.f32 %v419_v45, %v635_v8  ;;  %v434_v52 = vmul.f32 %v419_v45, %v637_v9  ;;  %vm360_vm11 = vmor %vm358_vm10, %vm359_vm9 }
 0x14c   : > { %v355_v54 = vsub.f32 1.0, %v354_v46  ;;  %v414_v5 = vmul.f32 %v715_v58, %v381_v53  ;;  %v418_v6 = vmul.f32 %v717_v60, %v381_v53  ;;  %v362_v9 = vand.u32 2147483647, %v727_v24 }
 0x14d   : > { %v441_v56 = vadd.f32 %v433_v51, %v425_v49  ;;  %v442_v57 = vadd.f32 %v434_v52, %v426_v50  ;;  %v365_v12 = vor.u32 1.1754944e-38, %v364_v55  ;;  %v409_v23 = vand.u32 2147483648, %v352_v43 }
 0x14e   : > { %v356_v8 = vmul.f32 %v565_v40, %v355_v54  ;;  %v423_v59 = vmul.f32 %v414_v5, %v639_v10  ;;  %v424_v61 = vmul.f32 %v414_v5, %v645_v13  ;;  %v431_v62 = vmul.f32 %v418_v6, %v647_v14 }
 0x14f   : > { %449 = vst [vmem:[%s745_s26 + $0x20] sm:$0xff] %v441_v56  ;;  %v432_v63 = vmul.f32 %v418_v6, %v649_v15  ;;  %vm363_vm12 = vcmp.eq.f32.partialorder %v362_v9, 8.507059e+37  ;;  %v407_v24 = vand.u32 2147483647, %v352_v43  ;;  %vm403_vm14 = vweird.f32 %v352_v43 }
 0x150   : > { %v567_v4 = vpop.eup %566  ;;  %450 = vst [vmem:[%s745_s26 + $0x28] sm:$0xff] %v442_v57  ;;  %v357_v58 = vadd.f32 %v565_v40, %v356_v8  ;;  %v439_v60 = vadd.f32 %v431_v62, %v423_v59 }
 0x151   : > { %v440_v7 = vadd.f32 %v432_v63, %v424_v61  ;;  %v399_v16 = vmul.f32 %v567_v4, %v352_v43  ;;  %vm404_vm13 = vweird.f32 %v567_v4  ;;  %vm408_vm0 = vcmp.eq.f32.partialorder %v407_v24, 8.507059e+37 }
 0x152   : > { %v361_v20 = vsel %vm360_vm11, %v565_v40, %v357_v58  ;;  %447 = vst [vmem:[%s745_s26 + $0x10] sm:$0xff] %v439_v60  ;;  %vm405_vm15 = vmor %vm403_vm14, %vm404_vm13 }
 0x153   : > { %v366_v10 = vsel %vm363_vm12, %v365_v12, %v361_v20  ;;  %v400_v13 = vsub.f32 1.0, %v399_v16  ;;  %448 = vst [vmem:[%s745_s26 + $0x18] sm:$0xff] %v440_v7 }
 0x154   : > { %v413_v14 = vmul.f32 %v721_v11, %v366_v10  ;;  %v417_v15 = vmul.f32 %v723_v22, %v366_v10  ;;  %v410_v22 = vor.u32 1.1754944e-38, %v409_v23 }
 0x155   : > { %v401_v25 = vmul.f32 %v567_v4, %v400_v13 }
 0x156   : > { %v421_v26 = vmul.f32 %v413_v14, %v619_v0  ;;  %v422_v27 = vmul.f32 %v413_v14, %v621_v1  ;;  %v429_v28 = vmul.f32 %v417_v15, %v623_v2  ;;  %v430_v29 = vmul.f32 %v417_v15, %v625_v3 }
 0x157   : > { %v402_v30 = vadd.f32 %v567_v4, %v401_v25 }
 0x158   : > { %v437_v31 = vadd.f32 %v429_v28, %v421_v26  ;;  %v438_v11 = vadd.f32 %v430_v29, %v422_v27 }
 0x159   : > { %v406_v32 = vsel %vm405_vm15, %v567_v4, %v402_v30 }
 0x15a   : > { %445 = vst [vmem:[%s745_s26] sm:$0xff] %v437_v31  ;;  %v411_v33 = vsel %vm408_vm0, %v410_v22, %v406_v32 }
 0x15b   : > { %446 = vst [vmem:[%s745_s26 + $0x8] sm:$0xff] %v438_v11  ;;  %v416_v0 = vmul.f32 %v730_v34, %v411_v33  ;;  %v420_v1 = vmul.f32 %v732_v38, %v411_v33 }
 0x15d   : > { %v427_v2 = vmul.f32 %v416_v0, %v651_v17  ;;  %v428_v3 = vmul.f32 %v416_v0, %v653_v18  ;;  %v435_v35 = vmul.f32 %v420_v1, %v655_v19  ;;  %v436_v36 = vmul.f32 %v420_v1, %v657_v21 }
 0x15f   : > { %v443_v37 = vadd.f32 %v435_v35, %v427_v2  ;;  %v444_v39 = vadd.f32 %v436_v36, %v428_v3 }
 0x161   : > { %451 = vst [vmem:[%s745_s26 + $0x30] sm:$0xff] %v443_v37 }
 0x162   : > { %452 = vst [vmem:[%s745_s26 + $0x38] sm:$0xff] %v444_v39 }
 0x163 PF: > { %s14_s15 = sadd.s32 1, %s574_s15  }
 0x164   : > { %p11_p4 = scmp.ge.s32.totalorder %s14_s15, 4  }
 0x166   :  { %13 = sbr.rel (!%p11_p4) target bundleno = 1 (0x1), region = 69 }

</bundles_post_ra>
